<compile_context>
chip_gen: v7x
topology: tpu7x:2x2x1
jax: 0.10.0
libtpu: 0.0.40
codegen_flags: <defaults>
</compile_context>

<pallas_src>
import jax
import jax.numpy as jnp
from jax.experimental import pallas as pl
from jax.experimental.pallas import tpu as pltpu

EMBED_SIZE = 4  # CanvasEncoder.embed_size

# Sublane packing per element size (bytes) — min legal/efficient row tile.
_SUBLANE_PACK = {4: 8, 2: 16, 1: 32}


def _copy_kernel(x_ref, o_ref):
    # Identity: stream the current tile through VMEM.
    o_ref[...] = x_ref[...]


def canvas_encoder(canvas: jax.Array) -> jax.Array:
    """Recommended implementation of CanvasEncoder.forward.

    The module is a pure identity; after the static equivalent of
    `assert canvas.size(2) == embed_size` we return the input aliased
    (zero HBM traffic), exactly like the PyTorch module.
    """
    assert canvas.shape[2] == EMBED_SIZE, (
        f"canvas.shape[2] must be {EMBED_SIZE}, got {canvas.shape[2]}"
    )
    return canvas


def _tpu_generation() -> str:
    try:
        kind = jax.devices()[0].device_kind.lower()
    except Exception:
        return "unknown"
    if "v6" in kind:
        return "v6e"
    if "v5" in kind:
        return "v5e"
    if "7" in kind:  # e.g. "TPU7x" / "TPU v7x"
        return "v7x"
    return "unknown"


def _pick_block_rows(rows: int, lanes: int, itemsize: int, min_rows: int,
                     target_bytes: int, num_tc: int) -> int:
    """Choose a sublane-aligned row tile near `target_bytes` per block."""
    target_rows = max(min_rows, target_bytes // max(1, lanes * itemsize))
    target_rows = max(min_rows, (target_rows // min_rows) * min_rows)

    if rows <= target_rows:
        # Whole array fits one block.  On multi-TC chips split in two so the
        # "parallel" grid axis lands DMAs on both TensorCores.
        if num_tc > 1 and rows >= 2 * min_rows:
            half = (rows + 1) // 2
            half = ((half + min_rows - 1) // min_rows) * min_rows
            return min(half, rows)
        return rows

    block_rows = target_rows
    # Prefer an aligned divisor of `rows` (no partial trailing block), but never
    # shrink below half the target — avoids the 32 KiB-block pathology.
    br = block_rows
    floor = max(min_rows, block_rows // 2)
    while br >= floor and rows % br != 0:
        br -= min_rows
    if br >= floor and rows % br == 0:
        return br
    return block_rows  # accept one partial trailing block via cdiv


def canvas_encoder_pallas(canvas: jax.Array, *, donate: bool = False) -> jax.Array:
    """Pallas identity copy of the canvas (explicit materialization / fusion point).

    Flattens to a lane-dense 2D layout and streams it through VMEM in
    generation-tuned blocks.  With donate=True the copy is skipped entirely
    (the result would alias the same buffer anyway).
    """
    assert canvas.shape[2] == EMBED_SIZE, (
        f"canvas.shape[2] must be {EMBED_SIZE}, got {canvas.shape[2]}"
    )

    if donate or canvas.size == 0:
        # An aliased copy of identical data is pure wasted HBM traffic.
        return canvas

    orig_shape = canvas.shape
    dtype = canvas.dtype
    itemsize = jnp.dtype(dtype).itemsize
    min_rows = _SUBLANE_PACK.get(itemsize, 8)
    n = canvas.size

    gen = _tpu_generation()
    if gen in ("v6e", "v7x"):
        target_block_bytes = 4 * 1024 * 1024   # 4 bufs x 4 MiB = 16 MiB, << 32 MiB scoped
    else:  # v5e / unknown: 16 MiB scoped default -> keep 2 MiB blocks (8 MiB total)
        target_block_bytes = 2 * 1024 * 1024
    num_tc = 2 if gen == "v7x" else 1

    # Widest lane-dense last dim (multiple of 128) dividing the total; otherwise
    # fall back to the natural last dim (full-dim lane block is always legal).
    lanes = None
    for cand in (1024, 512, 256, 128):
        if n % cand == 0:
            lanes = cand
            break
    if lanes is None:
        lanes = orig_shape[-1]

    rows = n // lanes
    flat = canvas.reshape(rows, lanes)  # row-major bitcast — free for dense inputs

    block_rows = _pick_block_rows(rows, lanes, itemsize, min_rows,
                                  target_block_bytes, num_tc)
    grid = (pl.cdiv(rows, block_rows),)

    block_bytes = block_rows * lanes * itemsize
    # in + out, double-buffered (4 blocks) plus headroom; clamp to a safe range.
    vmem_limit = max(16 << 20, min(4 * block_bytes + (4 << 20), 32 << 20))

    out_flat = pl.pallas_call(
        _copy_kernel,
        out_shape=jax.ShapeDtypeStruct((rows, lanes), dtype),
        grid=grid,
        in_specs=[pl.BlockSpec((block_rows, lanes), lambda i: (i, 0))],
        out_specs=pl.BlockSpec((block_rows, lanes), lambda i: (i, 0)),
        compiler_params=pltpu.CompilerParams(
            dimension_semantics=("parallel",),  # shards across v7x's 2 TensorCores
            vmem_limit_bytes=vmem_limit,
        ),
    )(flat)

    return out_flat.reshape(orig_shape)


if __name__ == "__main__":
    key = jax.random.PRNGKey(0)
    # Axis 2 must equal the embed size (4); other dims are free.
    B, S, E, D = 2, 8, EMBED_SIZE, 128
    canvas = jax.random.normal(key, (B, S, E, D), dtype=jnp.float32)

    # Primary path: zero-cost aliased identity — exactly the PyTorch semantics.
    out_fast = canvas_encoder(canvas)
    assert out_fast is canvas

    # Pallas copy path (lane-dense tiling, total divisible by 1024).
    out = jax.block_until_ready(canvas_encoder_pallas(canvas))
    assert out.shape == canvas.shape and out.dtype == canvas.dtype
    assert bool(jnp.array_equal(out, canvas))

    # donate=True: copy skipped entirely (same buffer back).
    out_donated = canvas_encoder_pallas(canvas, donate=True)
    assert out_donated is canvas

    # Fallback path: total not divisible by 128, bf16 (16-row sublane packing).
    canvas2 = jax.random.normal(
        jax.random.PRNGKey(1), (2, 8, EMBED_SIZE, 33), dtype=jnp.float32
    ).astype(jnp.bfloat16)
    out2 = jax.block_until_ready(canvas_encoder_pallas(canvas2))
    assert out2.shape == canvas2.shape and out2.dtype == canvas2.dtype
    assert bool(jnp.array_equal(out2, canvas2))

    print("KERNEL_OK")
</pallas_src>

<mosaic_0001>
module attributes {stable_mosaic.version = 11 : i64} {
  func.func @_copy_kernel(%arg0: i32, %arg1: memref<8x1024xf32, #tpu.memory_space<vmem>>, %arg2: memref<8x1024xf32, #tpu.memory_space<vmem>>) attributes {dimension_semantics = [#tpu.dimension_semantics<parallel>], iteration_bounds = array<i64: 1>, scalar_prefetch = 0 : i64, scratch_operands = 0 : i64, tpu.core_type = #tpu.core_type<tc>, window_params = [{transform_indices = @transform_0, window_bounds = array<i64: 8, 1024>}, {transform_indices = @transform_1, window_bounds = array<i64: 8, 1024>}]} {
    %c0 = arith.constant 0 : index
    %c0_0 = arith.constant 0 : index
    %0 = vector.load %arg1[%c0, %c0_0] : memref<8x1024xf32, #tpu.memory_space<vmem>>, vector<8x1024xf32>
    %c0_1 = arith.constant 0 : index
    %c0_2 = arith.constant 0 : index
    %1 = vector.load %arg2[%c0_1, %c0_2] : memref<8x1024xf32, #tpu.memory_space<vmem>>, vector<8x1024xf32>
    tpu.vector_store %arg2[%c0_1, %c0_2], %0 {strides = array<i32>} : memref<8x1024xf32, #tpu.memory_space<vmem>>, vector<8x1024xf32>,
    return
  }
  func.func @transform_0(%arg0: i32) -> (i32, i32) {
    %c0_i32 = arith.constant 0 : i32
    %c0_i32_0 = arith.constant 0 : i32
    return %arg0, %c0_i32 : i32, i32
  }
  func.func @transform_1(%arg0: i32) -> (i32, i32) {
    %c0_i32 = arith.constant 0 : i32
    %c0_i32_0 = arith.constant 0 : i32
    return %arg0, %c0_i32 : i32, i32
  }
}

</mosaic_0001>

<bundles_post_ra>
// kernel: tpu_custom_call.1
= control target key start
LH: loop header
LB: loop body
LE: loop exit
PB: predicated region body
PF: predicated region fallthrough
CT: control target
= control target key end

     0   :  { %6 = vsyncpa [#allocation3], 0  ;;  %s138_s0 = inlined_call_operand.hbm [shape: f32[8,1024], index: 0, kind: input, shape index: {}]   ;;  %s139_s1 = inlined_call_operand.hbm [shape: f32[8,1024], index: 1, kind: output, shape index: {}]  }
   0x1   :  { %7 = vsyncpa [#allocation4], 0  ;;  %s102_s6 = smov [#allocation2]   ;;  %s54_s10 = scalar_lea.hbm %s138_s0, 1024 }
   0x2   :  { %s14_s7 = sshll.u32 %s102_s6, 4  ;;  %p55_p0 = scmp.ne.s32.totalorder %s138_s0, %s54_s10  ;;  %s15_s7 = int_to_ptr.vmem [resolvable:$true] %s14_s7 }
   0x3   :  { %p58_p1 = scmp.lt.u32.totalorder %s54_s10, %s138_s0 }
   0x5   :  { %p60_p2 = pnand %p58_p1, %p55_p0 }
   0x7   :  { %63 = shalt.err (!%p60_p2)
}
   0x8   :  { %s64_s15 = scalar_lea.vmem %s15_s7, 1024  ;;  %p69_p4 = scmp.lt.s32.totalorder %s15_s7, %s15_s7 }
   0x9   :  { %p65_p3 = scmp.ne.s32.totalorder %s15_s7, %s64_s15  ;;  %p70_p5 = scmp.lt.s32.totalorder %s64_s15, %s64_s15 }
   0xb   :  { %p71_p6 = por %p70_p5, %p69_p4 }
   0xd   :  { %p72_p7 = pnand %p71_p6, %p65_p3 }
   0xf   :  { %75 = shalt.err (!%p72_p7)
}
  0x10   :  { %17 = dma.hbm_to_vmem [thread:$0]  %s138_s0, 1024, %s15_s7, [#allocation3]  }
  0x11   :  { %98 = dma.done.wait [#allocation3], 1024  }
  0x12   :  { %99 = vsyncadd [#allocation3], 4294966272  ;;  %s103_s18 = smov [#allocation5]   ;;  %v21_v0 = vld [vmem:[#allocation2] sm:$0xff]  ;;  %v22_v1 = vld [vmem:[#allocation2 + $0x8] sm:$0xff] }
  0x13   :  { %s43_s19 = sshll.u32 %s103_s18, 4  ;;  %v23_v2 = vld [vmem:[#allocation2 + $0x10] sm:$0xff]  ;;  %29 = vst [vmem:[#allocation5] sm:$0xff] %v21_v0  ;;  %30 = vst [vmem:[#allocation5 + $0x8] sm:$0xff] %v22_v1  ;;  %v24_v3 = vld [vmem:[#allocation2 + $0x18] sm:$0xff]  ;;  %s44_s19 = int_to_ptr.vmem [resolvable:$true] %s43_s19 }
  0x14   :  { %31 = vst [vmem:[#allocation5 + $0x10] sm:$0xff] %v23_v2  ;;  %v25_v4 = vld [vmem:[#allocation2 + $0x20] sm:$0xff]  ;;  %v26_v5 = vld [vmem:[#allocation2 + $0x28] sm:$0xff]  ;;  %32 = vst [vmem:[#allocation5 + $0x18] sm:$0xff] %v24_v3  ;;  %s76_s0 = scalar_lea.vmem %s44_s19, 1024  ;;  %p81_p9 = scmp.lt.s32.totalorder %s44_s19, %s44_s19 }
  0x15   :  { %33 = vst [vmem:[#allocation5 + $0x20] sm:$0xff] %v25_v4  ;;  %34 = vst [vmem:[#allocation5 + $0x28] sm:$0xff] %v26_v5  ;;  %v27_v6 = vld [vmem:[#allocation2 + $0x30] sm:$0xff]  ;;  %v28_v7 = vld [vmem:[#allocation2 + $0x38] sm:$0xff]  ;;  %p77_p8 = scmp.ne.s32.totalorder %s44_s19, %s76_s0  ;;  %p82_p10 = scmp.lt.s32.totalorder %s76_s0, %s76_s0 }
  0x16   :  { %35 = vst [vmem:[#allocation5 + $0x30] sm:$0xff] %v27_v6  ;;  %36 = vst [vmem:[#allocation5 + $0x38] sm:$0xff] %v28_v7 }
  0x17   :  { %p83_p11 = por %p82_p10, %p81_p9 }
  0x19   :  { %p84_p12 = pnand %p83_p11, %p77_p8 }
  0x1b   :  { %87 = shalt.err (!%p84_p12)
}
  0x1c   :  { %s88_s22 = scalar_lea.hbm %s139_s1, 1024 }
  0x1d   :  { %p89_p13 = scmp.ne.s32.totalorder %s139_s1, %s88_s22  ;;  %p92_p0 = scmp.lt.u32.totalorder %s88_s22, %s139_s1 }
  0x1f   :  { %p94_p1 = pnand %p92_p0, %p89_p13 }
  0x21   :  { %97 = shalt.err (!%p94_p1)
}
  0x22   :  { %46 = dma.vmem_to_hbm [thread:$0]  %s44_s19, 1024, %s139_s1, [#allocation4]  }
  0x23   :  { %100 = dma.done.wait [#allocation4], 1024  }
  0x24   :  { %101 = vsyncadd [#allocation4], 4294966272 }
  0x25   :  { %50 = vsyncpa [#allocation3], 1 }
  0x26   :  { %51 = vsyncpa [#allocation4], 1 }

</bundles_post_ra>
